<compile_context>
chip_gen: v6e
topology: v6e:2x2x1
jax: 0.10.0
libtpu: 0.0.40
codegen_flags: <defaults>
</compile_context>

<pallas_src>
import jax
import jax.numpy as jnp
import numpy as np
from jax.experimental import pallas as pl
from jax.experimental.pallas import tpu as pltpu


def _upsample1d_kernel(x_ref, xp_ref, xn_ref, wa_ref, wb_ref, b_ref, o_ref):
    # x_ref : (1, TL, C)    current length tile, channels on lanes
    # xp_ref: (1, 1, 1, C)  halo row x[m0 - 1]   (zero at sequence start)
    # xn_ref: (1, 1, 1, C)  halo row x[m0 + TL]  (zero at sequence end)
    # wa_ref: (C, 2C)       [W1 | W2]  unshifted taps, already in output slab layout
    # wb_ref: (C, 2C)       [W3 | W0]  shifted taps
    # b_ref : (1, 2C)       [bias | bias]
    # o_ref : (1, TL, 2C)   [:, :, :C] = even output rows, [:, :, C:] = odd output rows
    TL = x_ref.shape[1]
    C = wa_ref.shape[0]

    x = x_ref[0]  # (TL, C), sublane offset 0

    # Unshifted taps, already laid out as [even | odd], plus bias.
    acc = jnp.dot(x, wa_ref[...], preferred_element_type=jnp.float32) + b_ref[...]
    # Shifted taps: s = [x@W3 | x@W0]; even half must be shifted down one row
    # (row m needs x[m-1]@W3), odd half shifted up (row m needs x[m+1]@W0).
    s = jnp.dot(x, wb_ref[...], preferred_element_type=jnp.float32)

    xp = xp_ref[0, 0]  # (1, C) = x[m0 - 1]
    xn = xn_ref[0, 0]  # (1, C) = x[m0 + TL]
    even_head = jnp.dot(xp, wb_ref[:, 0:C], preferred_element_type=jnp.float32)       # x[m0-1]@W3
    odd_tail = jnp.dot(xn, wb_ref[:, C:2 * C], preferred_element_type=jnp.float32)    # x[m0+TL]@W0

    even = jnp.concatenate([even_head, s[:TL - 1, 0:C]], axis=0)     # row m: x[m-1] @ W3
    odd = jnp.concatenate([s[1:TL, C:2 * C], odd_tail], axis=0)      # row m: x[m+1] @ W0

    o_ref[0] = (acc + jnp.concatenate([even, odd], axis=1)).astype(o_ref.dtype)


def _pick_len_tile(L, target):
    """Largest multiple of 8 that divides L and is <= target (else whole L)."""
    if L <= target:
        return L
    t = (target // 8) * 8
    while t >= 8:
        if L % t == 0:
            return t
        t -= 8
    return L


def upsample1d(x, weight, bias, *, tl=512):
    """ConvTranspose1d(dim, dim, 4, stride=2, padding=1) forward.

    x:      (B, C, L)
    weight: (C, C, 4)   PyTorch layout (in_ch, out_ch, kernel)
    bias:   (C,)
    returns (B, C, 2L)
    """
    B, C, L = x.shape
    TL = _pick_len_tile(L, tl)
    T = L // TL

    # Layout plumbing in plain JAX (channels on lanes; weight slabs).
    x_t = jnp.transpose(x, (0, 2, 1))                   # (B, L, C)
    w = jnp.transpose(weight, (2, 0, 1))                # (4, Cin, Cout): w[k, ci, co]
    w_a = jnp.concatenate([w[1], w[2]], axis=1)         # (C, 2C)  unshifted taps [W1|W2]
    w_b = jnp.concatenate([w[3], w[0]], axis=1)         # (C, 2C)  shifted taps   [W3|W0]
    b2 = jnp.concatenate([bias, bias]).reshape(1, 2 * C).astype(jnp.float32)

    # Tiny per-tile halo rows (one row per length tile), zero at the sequence edges.
    x_r = x_t.reshape(B, T, TL, C)
    zero = jnp.zeros((B, 1, 1, C), x.dtype)
    x_prev = jnp.concatenate([zero, x_r[:, :T - 1, TL - 1:TL, :]], axis=1)  # (B,T,1,C): x[t*TL-1]
    x_next = jnp.concatenate([x_r[:, 1:, 0:1, :], zero], axis=1)            # (B,T,1,C): x[(t+1)*TL]

    itemsize = jnp.dtype(x.dtype).itemsize
    cost = pl.CostEstimate(
        flops=8 * B * L * C * C,
        transcendentals=0,
        bytes_accessed=itemsize * (3 * B * L * C + 2 * B * T * C) + 4 * (8 * C * C + 2 * C),
    )

    out = pl.pallas_call(
        _upsample1d_kernel,
        out_shape=jax.ShapeDtypeStruct((B, L, 2 * C), x.dtype),
        grid_spec=pltpu.PrefetchScalarGridSpec(
            num_scalar_prefetch=0,
            grid=(B, T),
            in_specs=[
                pl.BlockSpec((1, TL, C), lambda b, t: (b, t, 0)),       # tiled x
                pl.BlockSpec((1, 1, 1, C), lambda b, t: (b, t, 0, 0)),  # halo x[m0-1]
                pl.BlockSpec((1, 1, 1, C), lambda b, t: (b, t, 0, 0)),  # halo x[m0+TL]
                pl.BlockSpec((C, 2 * C), lambda b, t: (0, 0)),          # [W1|W2]
                pl.BlockSpec((C, 2 * C), lambda b, t: (0, 0)),          # [W3|W0]
                pl.BlockSpec((1, 2 * C), lambda b, t: (0, 0)),          # bias slab
            ],
            out_specs=pl.BlockSpec((1, TL, 2 * C), lambda b, t: (b, t, 0)),
        ),
        compiler_params=pltpu.CompilerParams(
            dimension_semantics=("parallel", "parallel")),
        cost_estimate=cost,
    )(x_t, x_prev, x_next, w_a, w_b, b2)

    # (B, L, 2C) -> (B, 2L, C) is free (same bytes, interleaves even/odd rows);
    # one transpose back to the module's NCL layout remains.
    y = out.reshape(B, 2 * L, C)
    return jnp.transpose(y, (0, 2, 1))


def _reference_numpy(x, weight, bias):
    # direct ConvTranspose1d(stride=2, pad=1, k=4) loop reference
    B, C, L = x.shape
    Lout = 2 * L
    y = np.zeros((B, C, Lout), np.float32)
    for b in range(B):
        for l in range(L):
            for k in range(4):
                t = 2 * l - 1 + k
                if 0 <= t < Lout:
                    y[b, :, t] += x[b, :, l] @ weight[:, :, k]
        y[b] += bias[:, None]
    return y


if __name__ == "__main__":
    key = jax.random.PRNGKey(0)
    k_x, k_w, k_b = jax.random.split(key, 3)

    B, dim, L = 2, 4, 16
    x = jax.random.normal(k_x, (B, dim, L), dtype=jnp.float32)
    # ConvTranspose1d weight shape: (in_channels, out_channels, kernel_size)
    weight = jax.random.normal(k_w, (dim, dim, 4), dtype=jnp.float32) * 0.1
    bias = jax.random.normal(k_b, (dim,), dtype=jnp.float32) * 0.1

    # Small length tile (8) so the multi-tile + halo path is exercised (L=16 -> 2 tiles).
    fn = jax.jit(lambda xx, ww, bb: upsample1d(xx, ww, bb, tl=8))
    y = jax.block_until_ready(fn(x, weight, bias))

    y_ref = _reference_numpy(np.asarray(x), np.asarray(weight), np.asarray(bias))
    np.testing.assert_allclose(np.asarray(y), y_ref, rtol=1e-5, atol=1e-5)

    print("KERNEL_OK")
</pallas_src>

<mosaic_0001>
module attributes {stable_mosaic.version = 11 : i64} {
  func.func @_upsample1d_kernel(%arg0: i32, %arg1: i32, %arg2: memref<1x8x4xf32, #tpu.memory_space<vmem>>, %arg3: memref<1x1x1x4xf32, #tpu.memory_space<vmem>>, %arg4: memref<1x1x1x4xf32, #tpu.memory_space<vmem>>, %arg5: memref<4x8xf32, #tpu.memory_space<vmem>>, %arg6: memref<4x8xf32, #tpu.memory_space<vmem>>, %arg7: memref<1x8xf32, #tpu.memory_space<vmem>>, %arg8: memref<1x8x8xf32, #tpu.memory_space<vmem>>) attributes {dimension_semantics = [#tpu.dimension_semantics<parallel>, #tpu.dimension_semantics<parallel>], iteration_bounds = array<i64: 2, 2>, scalar_prefetch = 0 : i64, scratch_operands = 0 : i64, tpu.core_type = #tpu.core_type<tc>, window_params = [{transform_indices = @transform_0, window_bounds = array<i64: 1, 8, 4>}, {transform_indices = @transform_1, window_bounds = array<i64: 1, 1, 1, 4>}, {transform_indices = @transform_2, window_bounds = array<i64: 1, 1, 1, 4>}, {pipeline_mode = #tpu.pipeline_mode<synchronous>, transform_indices = @transform_3, window_bounds = array<i64: 4, 8>}, {pipeline_mode = #tpu.pipeline_mode<synchronous>, transform_indices = @transform_4, window_bounds = array<i64: 4, 8>}, {pipeline_mode = #tpu.pipeline_mode<synchronous>, transform_indices = @transform_5, window_bounds = array<i64: 1, 8>}, {transform_indices = @transform_6, window_bounds = array<i64: 1, 8, 8>}]} {
    %c0 = arith.constant 0 : index
    %c0_0 = arith.constant 0 : index
    %c0_1 = arith.constant 0 : index
    %0 = vector.load %arg2[%c0, %c0_0, %c0_1] : memref<1x8x4xf32, #tpu.memory_space<vmem>>, vector<1x8x4xf32>
    %1 = vector.shape_cast %0 : vector<1x8x4xf32> to vector<8x4xf32>
    %c0_2 = arith.constant 0 : index
    %c0_3 = arith.constant 0 : index
    %2 = vector.load %arg5[%c0_2, %c0_3] : memref<4x8xf32, #tpu.memory_space<vmem>>, vector<4x8xf32>
    %cst = arith.constant dense<0.000000e+00> : vector<8x8xf32>
    %3 = tpu.matmul %1, %2, %cst {dimension_numbers = #tpu.dot_dimension_numbers<[1], [0], [0], [1], [0, 0, 1, 1], [], []>} : vector<8x4xf32>, vector<4x8xf32>, vector<8x8xf32> -> vector<8x8xf32>
    %c0_4 = arith.constant 0 : index
    %c0_5 = arith.constant 0 : index
    %4 = vector.load %arg7[%c0_4, %c0_5] : memref<1x8xf32, #tpu.memory_space<vmem>>, vector<1x8xf32>
    %5 = vector.broadcast %4 : vector<1x8xf32> to vector<8x8xf32>
    %6 = arith.addf %3, %5 : vector<8x8xf32>
    %c0_6 = arith.constant 0 : index
    %c0_7 = arith.constant 0 : index
    %7 = vector.load %arg6[%c0_6, %c0_7] : memref<4x8xf32, #tpu.memory_space<vmem>>, vector<4x8xf32>
    %cst_8 = arith.constant dense<0.000000e+00> : vector<8x8xf32>
    %8 = tpu.matmul %1, %7, %cst_8 {dimension_numbers = #tpu.dot_dimension_numbers<[1], [0], [0], [1], [0, 0, 1, 1], [], []>} : vector<8x4xf32>, vector<4x8xf32>, vector<8x8xf32> -> vector<8x8xf32>
    %c0_9 = arith.constant 0 : index
    %c0_10 = arith.constant 0 : index
    %c0_11 = arith.constant 0 : index
    %c0_12 = arith.constant 0 : index
    %9 = vector.load %arg3[%c0_9, %c0_10, %c0_11, %c0_12] : memref<1x1x1x4xf32, #tpu.memory_space<vmem>>, vector<1x1x1x4xf32>
    %10 = vector.shape_cast %9 : vector<1x1x1x4xf32> to vector<1x4xf32>
    %c0_13 = arith.constant 0 : index
    %c0_14 = arith.constant 0 : index
    %c0_15 = arith.constant 0 : index
    %c0_16 = arith.constant 0 : index
    %11 = vector.load %arg4[%c0_13, %c0_14, %c0_15, %c0_16] : memref<1x1x1x4xf32, #tpu.memory_space<vmem>>, vector<1x1x1x4xf32>
    %12 = vector.shape_cast %11 : vector<1x1x1x4xf32> to vector<1x4xf32>
    %c0_17 = arith.constant 0 : index
    %c0_18 = arith.constant 0 : index
    %13 = vector.load %arg6[%c0_17, %c0_18] : memref<4x8xf32, #tpu.memory_space<vmem>>, vector<4x4xf32>
    %cst_19 = arith.constant dense<0.000000e+00> : vector<1x4xf32>
    %14 = tpu.matmul %10, %13, %cst_19 {dimension_numbers = #tpu.dot_dimension_numbers<[1], [0], [0], [1], [0, 0, 1, 1], [], []>} : vector<1x4xf32>, vector<4x4xf32>, vector<1x4xf32> -> vector<1x4xf32>
    %c0_20 = arith.constant 0 : index
    %c4 = arith.constant 4 : index
    %15 = vector.load %arg6[%c0_20, %c4] : memref<4x8xf32, #tpu.memory_space<vmem>>, vector<4x4xf32>
    %cst_21 = arith.constant dense<0.000000e+00> : vector<1x4xf32>
    %16 = tpu.matmul %12, %15, %cst_21 {dimension_numbers = #tpu.dot_dimension_numbers<[1], [0], [0], [1], [0, 0, 1, 1], [], []>} : vector<1x4xf32>, vector<4x4xf32>, vector<1x4xf32> -> vector<1x4xf32>
    %17 = vector.extract_strided_slice %8 {offsets = [0, 0], sizes = [7, 4], strides = [1, 1]} : vector<8x8xf32> to vector<7x4xf32>
    %18 = tpu.concatenate %14, %17 in 0 : vector<1x4xf32>, vector<7x4xf32> -> vector<8x4xf32>
    %19 = vector.extract_strided_slice %8 {offsets = [1, 4], sizes = [7, 4], strides = [1, 1]} : vector<8x8xf32> to vector<7x4xf32>
    %20 = tpu.concatenate %19, %16 in 0 : vector<7x4xf32>, vector<1x4xf32> -> vector<8x4xf32>
    %21 = tpu.concatenate %18, %20 in 1 : vector<8x4xf32>, vector<8x4xf32> -> vector<8x8xf32>
    %22 = arith.addf %6, %21 : vector<8x8xf32>
    %c0_22 = arith.constant 0 : index
    %c0_23 = arith.constant 0 : index
    %c0_24 = arith.constant 0 : index
    %23 = vector.load %arg8[%c0_22, %c0_23, %c0_24] : memref<1x8x8xf32, #tpu.memory_space<vmem>>, vector<1x8x8xf32>
    %24 = vector.shape_cast %23 : vector<1x8x8xf32> to vector<8x8xf32>
    %25 = vector.shape_cast %22 : vector<8x8xf32> to vector<1x8x8xf32>
    tpu.vector_store %arg8[%c0_22, %c0_23, %c0_24], %25 {strides = array<i32>} : memref<1x8x8xf32, #tpu.memory_space<vmem>>, vector<1x8x8xf32>,
    return
  }
  func.func @transform_0(%arg0: i32, %arg1: i32) -> (i32, i32, i32) {
    %c0_i32 = arith.constant 0 : i32
    %c0_i32_0 = arith.constant 0 : i32
    return %arg0, %arg1, %c0_i32 : i32, i32, i32
  }
  func.func @transform_1(%arg0: i32, %arg1: i32) -> (i32, i32, i32, i32) {
    %c0_i32 = arith.constant 0 : i32
    %c0_i32_0 = arith.constant 0 : i32
    %c0_i32_1 = arith.constant 0 : i32
    return %arg0, %arg1, %c0_i32, %c0_i32_0 : i32, i32, i32, i32
  }
  func.func @transform_2(%arg0: i32, %arg1: i32) -> (i32, i32, i32, i32) {
    %c0_i32 = arith.constant 0 : i32
    %c0_i32_0 = arith.constant 0 : i32
    %c0_i32_1 = arith.constant 0 : i32
    return %arg0, %arg1, %c0_i32, %c0_i32_0 : i32, i32, i32, i32
  }
  func.func @transform_3(%arg0: i32, %arg1: i32) -> (i32, i32) {
    %c0_i32 = arith.constant 0 : i32
    %c0_i32_0 = arith.constant 0 : i32
    %c0_i32_1 = arith.constant 0 : i32
    return %c0_i32, %c0_i32_0 : i32, i32
  }
  func.func @transform_4(%arg0: i32, %arg1: i32) -> (i32, i32) {
    %c0_i32 = arith.constant 0 : i32
    %c0_i32_0 = arith.constant 0 : i32
    %c0_i32_1 = arith.constant 0 : i32
    return %c0_i32, %c0_i32_0 : i32, i32
  }
  func.func @transform_5(%arg0: i32, %arg1: i32) -> (i32, i32) {
    %c0_i32 = arith.constant 0 : i32
    %c0_i32_0 = arith.constant 0 : i32
    %c0_i32_1 = arith.constant 0 : i32
    return %c0_i32, %c0_i32_0 : i32, i32
  }
  func.func @transform_6(%arg0: i32, %arg1: i32) -> (i32, i32, i32) {
    %c0_i32 = arith.constant 0 : i32
    %c0_i32_0 = arith.constant 0 : i32
    return %arg0, %arg1, %c0_i32 : i32, i32, i32
  }
}

</mosaic_0001>

<bundles_post_ra>
// kernel: _lambda_.1
= control target key start
LH: loop header
LB: loop body
LE: loop exit
PB: predicated region body
PF: predicated region fallthrough
CT: control target
= control target key end

     0   :  { %s959_s21 = smov 0   ;;  %s961_s22 = smov 0   ;;  %s1051_s0 = inlined_call_operand.vmem [shape: f32[2,16,4], index: 0, kind: input, shape index: {}]   ;;  %s1052_s1 = inlined_call_operand.vmem [shape: f32[2,2,1,4], index: 1, kind: input, shape index: {}]   ;;  %s1053_s2 = inlined_call_operand.vmem [shape: f32[2,2,1,4], index: 2, kind: input, shape index: {}]   ;;  %s1054_s3 = inlined_call_operand.vmem [shape: f32[4,8], index: 3, kind: input, shape index: {}]   ;;  %s1055_s4 = inlined_call_operand.vmem [shape: f32[4,8], index: 4, kind: input, shape index: {}]   ;;  %s1056_s5 = inlined_call_operand.vmem [shape: f32[1,8], index: 5, kind: input, shape index: {}]   ;;  %s1057_s6 = inlined_call_operand.vmem [shape: f32[2,16,8], index: 6, kind: output, shape index: {}]  }
   0x1   :  { %s963_s23 = smov 0   ;;  %s965_s24 = smov 0  }
   0x2   :  { %s967_s25 = smov 0  }
   0x3 LB: > { %s25_s26 = sadd.s32 1, %s910_s23  ;;  %s28_s27 = sadd.s32 1, %s914_s24  ;;  %s918_s25 = sphi %s967_s25, %s16_s25   ;;  %s914_s24 = sphi %s965_s24, %s1061_s24   ;;  %s910_s23 = sphi %s963_s23, %s1060_s23   ;;  %s906_s22 = sphi %s961_s22, %s1059_s22   ;;  %s902_s21 = sphi %s959_s21, %s1058_s21  }
   0x4   : > { %p26_p0 = scmp.ge.s32.totalorder %s25_s26, 2  ;;  %p790_p1 = scmp.ge.s32.totalorder %s918_s25, 1 }
   0x5   : > { %p259_p2 = scmp.lt.s32.totalorder %s918_s25, 5 }
   0x6   : > { %s1063_s26 = smov (%p26_p0, %s25_s26), 0  ;;  %s1065_s27 = smov (!%p26_p0, %s28_s27), %s914_s24 }
   0x7   : > { %p260_p3 = pnand %p790_p1, %p259_p2  ;;  %p30_p4 = scmp.ge.s32.totalorder %s1065_s27, 2 }
   0x8   : > { %s920_s30 = smov (!%p260_p3), 124   ;;  %p309_p5 = scmp.lt.s32.totalorder (!%p260_p3), %s906_s22, 1 }
   0x9   : > { %s1067_s27 = smov (%p30_p4, %s1065_s27), 0  ;;  %263 = sbr.rel (%p260_p3) target bundleno = 446 (0x1be), region = 44 }
   0xa   : > { %p311_p6 = scmp.lt.s32.totalorder (!%p260_p3), %s902_s21, 1 }
   0xe   : > { %v426_v0 = vld [vmem:[%s1055_s4] sm:$0xf]  ;;  %vm352_vm0 = vcmask 1043456   ;;  %v921_v1 = vmov 0.0   ;;  %vm922_vm1 = vmmov 0   ;;  %s1069_s22 = smov (!%p309_p5, %s906_s22), 1 }
   0xf   : > { %575 = vrot.lane.b32.xlu0 %v426_v0, %s920_s30  ;;  %821 = vmatprep.subr.mxu1 %v921_v1  ;;  %v340_v2 = vld [vmem:[%s1054_s3] sm:$0xf]  ;;  %s1071_s21 = smov (!%p311_p6, %s902_s21), 1  ;;  %s791_s9 = sshll.u32 %s1069_s22, 1  ;;  %vm348_vm2 = vcmask 31744   ;;  %vm655_vm3 = vcmask 1040384  }
  0x10   : > { %816 = vmatprep.subr.mxu0 %v921_v1  ;;  %822 = vmatpush3.msk.msra.mxu1 %vm352_vm0, %v426_v0  ;;  %s1003_s10 = sadd.s32 %s791_s9, %s1071_s21  ;;  %s923_s21 = smov 4   ;;  %v797_v18 = vld [vmem:[%s1056_s5] ss:$0 sm:$0xff]  ;;  %vm664_vm4 = vcmask 1046528   ;;  %vm668_vm5 = vcmask 64512  }
  0x11   : > { %823 = vmatprep.mubr.msk.f32.mxu1 %vm922_vm1, %v921_v1  ;;  %817 = vmatpush3.msk.msra.mxu0 %vm352_vm0, %v340_v2  ;;  %s792_s11 = sshll.u32 %s1003_s10, 3  ;;  %s323_s17 = scalar_lea.vmem %s1052_s1, %s1003_s10 }
  0x12   : > { %818 = vmatprep.mubr.msk.f32.mxu0 %vm922_vm1, %v921_v1  ;;  %831 = vmatprep.subr.mxu1 %v921_v1  ;;  %s316_s14 = scalar_lea.vmem %s1051_s0, %s792_s11  ;;  %v500_v4 = vld [vmem:[%s323_s17] sm:$0x1]  ;;  %s330_s20 = scalar_lea.vmem %s1053_s2, %s1003_s10 }
  0x13   : > { %826 = vmatprep.subr.mxu0 %v921_v1  ;;  %v339_v3 = vld [vmem:[%s316_s14] sm:$0xff]  ;;  %s338_s7 = scalar_lea.vmem %s1057_s6, %s792_s11 }
  0x14   : > { %824 = vmatmul.mubr.msk.f32.vlgmr.msra.gmra.mxu1 %vm348_vm2, %v339_v3  ;;  %819 = vmatmul.mubr.msk.f32.vlgmr.msra.gmra.mxu0 %vm348_vm2, %v339_v3  ;;  %v501_v5 = vld [vmem:[%s330_s20] sm:$0x1] }
  0x15   : > { %833 = vmatprep.mubr.msk.f32.mxu1 %vm922_vm1, %v921_v1  ;;  %827 = vmatpush3.msk.msra.mxu0 %vm352_vm0, %v426_v0 }
  0x16   : > { %828 = vmatprep.mubr.msk.f32.mxu0 %vm922_vm1, %v921_v1 }
  0x18   : > { %829 = vmatmul.mubr.msk.f32.vlgmr.msra.gmra.mxu0 %vm348_vm2, %v500_v4 }
  0x81   : > { %v576_v6 = vpop.permute.xlu0 %575 }
  0x82   : > { %832 = vmatpush3.msk.msra.mxu1 %vm352_vm0, %v576_v6 }
  0x83   : > { %834 = vmatmul.mubr.msk.f32.vlgmr.msra.gmra.mxu1 %vm348_vm2, %v501_v5 }
  0xd4   : > { %v496_v7 = vpop.f32.mrf.mxu1  ;;  %v422_v8 = vpop.f32.mrf.mxu0 }
  0xd5   : > { %v653_v9 = vrot.slane %v496_v7, 7  ;;  %v657_v19 = vrot.slane %v496_v7, 1  ;;  %v423_v21 = vadd.f32 %v797_v18, %v422_v8 }
  0xd6   : > { %v825_v10 = vpop.f32.mrf.mxu1  ;;  %v820_v11 = vpop.f32.mrf.mxu0 }
  0xd8   : > { %v571_v12 = vpop.f32.mrf.mxu0 }
  0xd9   : > { %v656_v13 = vsel %vm655_vm3, %v571_v12, %v653_v9 }
  0xda   : > { %v830_v14 = vpop.f32.mrf.mxu0 }
 0x143   : > { %v648_v15 = vpop.f32.mrf.mxu1 }
 0x144   : > { %v660_v16 = vrot.slane %v648_v15, 1 }
 0x145   : > { %v835_v17 = vpop.f32.mrf.mxu1 }
 0x146   : > { %661 = vrot.lane.b32.xlu0 %v660_v16, %s923_s21 }
 0x1b8   : > { %v662_v20 = vpop.permute.xlu0 %661 }
 0x1b9   : > { %v665_v22 = vsel %vm664_vm4, %v657_v19, %v662_v20 }
 0x1ba   : > { %v666_v23 = vsel %vm348_vm2, %v656_v13, %v665_v22 }
 0x1bb   : > { %v667_v24 = vadd.f32 %v666_v23, %v423_v21 }
 0x1bd   : > { %669 = vst.msk [vmem:[%s338_s7] sm:$0xff] %vm668_vm5, %v667_v24 }
 0x1be PF: > { %s16_s25 = sadd.s32 1, %s918_s25   ;;  %s1058_s21 = smov %s910_s23 }
 0x1bf   : > { %p13_p7 = scmp.ge.s32.totalorder %s16_s25, 6   ;;  %s1059_s22 = smov %s914_s24 }
 0x1c0   : > { %s1060_s23 = smov %s1063_s26  ;;  %s1061_s24 = smov %s1067_s27 }
 0x1c1   :  { %15 = sbr.rel (!%p13_p7) target bundleno = 3 (0x3), region = 80 }

</bundles_post_ra>
